<compile_context>
chip_gen: v6e
topology: v6e:2x2x1
jax: 0.10.0
libtpu: 0.0.40
codegen_flags: <defaults>
</compile_context>

<pallas_src>
import functools

import jax
import jax.numpy as jnp
from jax.experimental import pallas as pl
from jax.experimental.pallas import tpu as pltpu

HIDDEN = 64            # fixed by the PyTorch module
FUSED_H = 2 * HIDDEN   # 128: policy-hidden ++ value-hidden, one full vreg lane


def _round_up(x, m):
    return ((x + m - 1) // m) * m


def _net_kernel(x_ref, slab_ref, logits_ref, values_ref, *,
                s_dim, a_dim, out_pad, w1_rows):
    """Fused two-matmul forward.

    slab layout (rows x 128, bf16):
      rows [0, s_dim)                        : W1 = [wpi1 | wv1]   (s_dim, 128)
      rows [w1_rows, w1_rows + out_pad)      : W2^T block-diag     (out_pad, 128)
      rows [w1_rows + out_pad, ... + 2)      : row 0 = b1, row 1 = b2 (padded)
    """
    # Static views into the packed constant slab (no runtime cost).
    w1 = slab_ref[pl.ds(0, s_dim), :]                         # (s_dim, 128) bf16
    w2t = slab_ref[pl.ds(w1_rows, out_pad), :]                # (out_pad, 128) bf16
    b = slab_ref[pl.ds(w1_rows + out_pad, 2), :]              # (2, 128) bf16
    b1 = b[0:1, :].astype(jnp.float32)                        # (1, 128)
    b2 = b[1:2, :out_pad].astype(jnp.float32)                 # (1, out_pad)

    x = x_ref[...].astype(jnp.bfloat16)                       # (B, s_dim)

    # Layer 1: fused [pi1 | v1] hidden — one 128-wide bf16 MXU matmul,
    # f32 accumulation, bias add + tanh in f32.
    h = jnp.tanh(
        jnp.dot(x, w1, preferred_element_type=jnp.float32) + b1
    )                                                         # (B, 128) f32

    # Layer 2: block-diagonal head weights stored transposed (out_pad, 128);
    # contract the last dims of both operands so no zero-padded 128-wide W2
    # is ever loaded.  bf16 MXU, f32 accumulation.
    out2 = jax.lax.dot_general(
        h.astype(jnp.bfloat16), w2t,
        dimension_numbers=(((1,), (1,)), ((), ())),
        preferred_element_type=jnp.float32,
    ) + b2                                                    # (B, out_pad) f32

    logits_ref[...] = out2[:, :a_dim]
    values_ref[...] = out2[:, a_dim:a_dim + 1]


def net_forward(x, packed, a_dim):
    """Forward pass. x: (B, s_dim) f32. Returns (logits (B, a_dim), values (B, 1))."""
    slab, meta = packed
    s_dim, out_pad, w1_rows = meta
    B = x.shape[0]
    assert x.shape[1] == s_dim

    vmem = pl.BlockSpec(memory_space=pltpu.MemorySpace.VMEM)

    flops = 2 * B * s_dim * FUSED_H + 2 * B * FUSED_H * out_pad
    bytes_accessed = (4 * B * s_dim            # x (f32)
                      + 2 * slab.size          # packed bf16 constants
                      + 4 * B * (a_dim + 1))   # logits + values (f32)
    cost = pl.CostEstimate(
        flops=flops,
        transcendentals=B * FUSED_H,
        bytes_accessed=bytes_accessed,
    )

    kernel = functools.partial(
        _net_kernel, s_dim=s_dim, a_dim=a_dim, out_pad=out_pad, w1_rows=w1_rows)

    logits, values = pl.pallas_call(
        kernel,
        out_shape=(jax.ShapeDtypeStruct((B, a_dim), jnp.float32),
                   jax.ShapeDtypeStruct((B, 1), jnp.float32)),
        in_specs=[vmem, vmem],
        out_specs=(vmem, vmem),
        cost_estimate=cost,
    )(x, slab)
    return logits, values


def init_params(key, s_dim, a_dim, hidden=HIDDEN):
    """Deterministic init mimicking set_init: N(0, 0.1) weights, zero biases.

    Weights stored pre-transposed as (in_features, out_features)."""
    k1, k2, k3, k4 = jax.random.split(key, 4)
    std = 0.1
    wpi1 = std * jax.random.normal(k1, (s_dim, hidden), jnp.float32)
    bpi1 = jnp.zeros((1, hidden), jnp.float32)
    wpi2 = std * jax.random.normal(k2, (hidden, a_dim), jnp.float32)
    bpi2 = jnp.zeros((1, a_dim), jnp.float32)
    wv1 = std * jax.random.normal(k3, (s_dim, hidden), jnp.float32)
    bv1 = jnp.zeros((1, hidden), jnp.float32)
    wv2 = std * jax.random.normal(k4, (hidden, 1), jnp.float32)
    bv2 = jnp.zeros((1, 1), jnp.float32)
    return (wpi1, bpi1, wpi2, bpi2, wv1, bv1, wv2, bv2)


def pack_params(params, a_dim, hidden=HIDDEN):
    """One-time host-side fusion of all constants into ONE bf16 slab.

    Returns ((slab, (s_dim, out_pad, w1_rows))):
      slab rows [0, s_dim)                  : [wpi1 | wv1]                (s_dim, 128)
      slab rows [w1_rows, w1_rows+out_pad)  : block-diag second layer, transposed:
                                              rows [:a_dim]  <- wpi2.T  (policy head)
                                              row  [a_dim]   <- wv2.T   (value head)
      slab rows [w1_rows+out_pad, +2)       : row 0 = fused b1, row 1 = padded b2
    Sections are padded to 8-row boundaries so the in-kernel static slices of
    the packed bf16 slab stay sublane-tile aligned.
    """
    wpi1, bpi1, wpi2, bpi2, wv1, bv1, wv2, bv2 = params
    s_dim = wpi1.shape[0]
    fused_h = 2 * hidden
    assert fused_h == FUSED_H

    out_pad = max(8, _round_up(a_dim + 1, 8))
    assert a_dim + 1 <= out_pad, "value column would clip/overlap the logits"
    w1_rows = _round_up(s_dim, 8)

    # Layer 1: side-by-side heads.
    w1 = jnp.zeros((w1_rows, fused_h), jnp.float32)
    w1 = w1.at[:s_dim, :hidden].set(wpi1)
    w1 = w1.at[:s_dim, hidden:].set(wv1)

    # Layer 2: block-diagonal, stored transposed (out_pad, 128).
    w2t = jnp.zeros((out_pad, fused_h), jnp.float32)
    w2t = w2t.at[:a_dim, :hidden].set(wpi2.T)          # policy head block
    w2t = w2t.at[a_dim, hidden:].set(wv2[:, 0])        # value head block

    # Biases (one 128-wide row each).
    b1 = jnp.concatenate([bpi1, bv1], axis=1)          # (1, 128)
    b2 = jnp.zeros((1, fused_h), jnp.float32)
    b2 = b2.at[:, :a_dim].set(bpi2)
    b2 = b2.at[:, a_dim:a_dim + 1].set(bv2)

    slab = jnp.concatenate([w1, w2t, b1, b2], axis=0).astype(jnp.bfloat16)
    return slab, (s_dim, out_pad, w1_rows)


if __name__ == "__main__":
    # Small shapes consistent with a gym-style A3C net (e.g. CartPole):
    # batch=8, s_dim=4, a_dim=2, hidden=64 (fixed by the module).
    B, S_DIM, A_DIM = 8, 4, 2

    key = jax.random.PRNGKey(0)
    kx, kp = jax.random.split(key)
    x = jax.random.normal(kx, (B, S_DIM), jnp.float32)
    params = init_params(kp, S_DIM, A_DIM)
    packed = pack_params(params, A_DIM)

    logits, values = net_forward(x, packed, A_DIM)
    jax.block_until_ready((logits, values))

    # Pure-JAX f32 reference of the original (un-fused) two-head math.
    # Tolerance loosened for the bf16 weight path (accumulation stays f32).
    wpi1, bpi1, wpi2, bpi2, wv1, bv1, wv2, bv2 = params
    ref_logits = jnp.tanh(x @ wpi1 + bpi1) @ wpi2 + bpi2
    ref_values = jnp.tanh(x @ wv1 + bv1) @ wv2 + bv2
    assert logits.shape == (B, A_DIM) and values.shape == (B, 1)
    assert jnp.allclose(logits, ref_logits, atol=2e-2), (logits, ref_logits)
    assert jnp.allclose(values, ref_values, atol=2e-2), (values, ref_values)

    print("KERNEL_OK")
</pallas_src>

<mosaic_0001>
module attributes {stable_mosaic.version = 11 : i64} {
  func.func @_net_kernel(%arg0: memref<8x4xf32, #tpu.memory_space<vmem>>, %arg1: memref<18x128xbf16, #tpu.memory_space<vmem>>, %arg2: memref<8x2xf32, #tpu.memory_space<vmem>>, %arg3: memref<8x1xf32, #tpu.memory_space<vmem>>) attributes {dimension_semantics = [], scalar_prefetch = 0 : i64, scratch_operands = 0 : i64, tpu.core_type = #tpu.core_type<tc>} {
    %c0 = arith.constant 0 : index
    %c0_0 = arith.constant 0 : index
    %0 = vector.load %arg1[%c0, %c0_0] : memref<18x128xbf16, #tpu.memory_space<vmem>>, vector<4x128xbf16>
    %c8 = arith.constant 8 : index
    %c0_1 = arith.constant 0 : index
    %1 = vector.load %arg1[%c8, %c0_1] : memref<18x128xbf16, #tpu.memory_space<vmem>>, vector<8x128xbf16>
    %c16 = arith.constant 16 : index
    %c0_2 = arith.constant 0 : index
    %2 = vector.load %arg1[%c16, %c0_2] : memref<18x128xbf16, #tpu.memory_space<vmem>>, vector<2x128xbf16>
    %3 = vector.extract_strided_slice %2 {offsets = [0, 0], sizes = [1, 128], strides = [1, 1]} : vector<2x128xbf16> to vector<1x128xbf16>
    %4 = arith.extf %3 : vector<1x128xbf16> to vector<1x128xf32>
    %5 = vector.extract_strided_slice %2 {offsets = [1, 0], sizes = [1, 8], strides = [1, 1]} : vector<2x128xbf16> to vector<1x8xbf16>
    %6 = arith.extf %5 : vector<1x8xbf16> to vector<1x8xf32>
    %c0_3 = arith.constant 0 : index
    %c0_4 = arith.constant 0 : index
    %7 = vector.load %arg0[%c0_3, %c0_4] : memref<8x4xf32, #tpu.memory_space<vmem>>, vector<8x4xf32>
    %8 = arith.truncf %7 : vector<8x4xf32> to vector<8x4xbf16>
    %cst = arith.constant dense<0.000000e+00> : vector<8x128xf32>
    %9 = tpu.matmul %8, %0, %cst {dimension_numbers = #tpu.dot_dimension_numbers<[1], [0], [0], [1], [0, 0, 1, 1], [], []>} : vector<8x4xbf16>, vector<4x128xbf16>, vector<8x128xf32> -> vector<8x128xf32>
    %10 = vector.broadcast %4 : vector<1x128xf32> to vector<8x128xf32>
    %11 = arith.addf %9, %10 : vector<8x128xf32>
    %12 = math.tanh %11 : vector<8x128xf32>
    %13 = arith.truncf %12 : vector<8x128xf32> to vector<8x128xbf16>
    %cst_5 = arith.constant dense<0.000000e+00> : vector<8x8xf32>
    %14 = tpu.matmul %13, %1, %cst_5 {dimension_numbers = #tpu.dot_dimension_numbers<[1], [1], [0], [0], [0, 0, 1, 0], [], []>} : vector<8x128xbf16>, vector<8x128xbf16>, vector<8x8xf32> -> vector<8x8xf32>
    %15 = vector.broadcast %6 : vector<1x8xf32> to vector<8x8xf32>
    %16 = arith.addf %14, %15 : vector<8x8xf32>
    %17 = vector.extract_strided_slice %16 {offsets = [0, 0], sizes = [8, 2], strides = [1, 1]} : vector<8x8xf32> to vector<8x2xf32>
    %c0_6 = arith.constant 0 : index
    %c0_7 = arith.constant 0 : index
    %18 = vector.load %arg2[%c0_6, %c0_7] : memref<8x2xf32, #tpu.memory_space<vmem>>, vector<8x2xf32>
    tpu.vector_store %arg2[%c0_6, %c0_7], %17 {strides = array<i32>} : memref<8x2xf32, #tpu.memory_space<vmem>>, vector<8x2xf32>,
    %19 = vector.extract_strided_slice %16 {offsets = [0, 2], sizes = [8, 1], strides = [1, 1]} : vector<8x8xf32> to vector<8x1xf32>
    %c0_8 = arith.constant 0 : index
    %c0_9 = arith.constant 0 : index
    %20 = vector.load %arg3[%c0_8, %c0_9] : memref<8x1xf32, #tpu.memory_space<vmem>>, vector<8x1xf32>
    tpu.vector_store %arg3[%c0_8, %c0_9], %19 {strides = array<i32>} : memref<8x1xf32, #tpu.memory_space<vmem>>, vector<8x1xf32>,
    return
  }
}

</mosaic_0001>

<bundles_post_ra>
// kernel: tpu_custom_call.1
= control target key start
LH: loop header
LB: loop body
LE: loop exit
PB: predicated region body
PF: predicated region fallthrough
CT: control target
= control target key end

     0   :  { %vm28_vm0 = vcmask 1041408   ;;  %v156_v0 = vmov 0.0   ;;  %vm157_vm1 = vmmov 0   ;;  %vm24_vm2 = vcmask 31744   ;;  %s158_s20 = smov 126   ;;  %s197_s1 = inlined_call_operand.vmem [shape: bf16[18,128], index: 1, kind: input, shape index: {}]   ;;  %s198_s0 = inlined_call_operand.vmem [shape: f32[8,4], index: 0, kind: input, shape index: {}]   ;;  %s199_s2 = inlined_call_operand.vmem [shape: f32[8,2], index: 2, kind: output, shape index: {0}]   ;;  %s200_s3 = inlined_call_operand.vmem [shape: f32[8,1], index: 3, kind: output, shape index: {1}]  }
   0x1   :  { %139 = vmatprep.subr.bf16.mxu0 %v156_v0  ;;  %v14_v1 = vld [vmem:[%s197_s1] sm:$0x3]  ;;  %141 = vmatprep.mubr.msk.bf16.mxu0 %vm157_vm1, %v156_v0  ;;  %v15_v5 = vld [vmem:[%s197_s1 + $0x4] sm:$0xf]  ;;  %v20_v6 = vlaneseq  ;;  %v16_v8 = vld [vmem:[%s197_s1 + $0x8] sm:$0x1] }
   0x2   :  { %v18_v2 = vld [vmem:[%s198_s0] sm:$0xff]  ;;  %v30_v3 = vsel %vm28_vm0, %v14_v1, 0  ;;  %145 = vmatprep.subr.bf16.mxu1 %v156_v0  ;;  %147 = vmatprep.mubr.msk.bf16.mxu1 %vm157_vm1, %v156_v0  ;;  %v17_v9 = vunpack.c.l.bf16 %v16_v8  ;;  %vm118_vm3 = vcmask 15360   ;;  %vm124_vm4 = vcmask 7168  }
   0x3   :  { %v19_v4 = vpack.c.bf16 %v18_v2, %v18_v2  ;;  %140 = vmatpush3.bf16.msra.mxu0 %v30_v3  ;;  %146 = vmatpush3.bf16.xpose.msra.mxu1 %v15_v5  ;;  %v21_v7 = vshrl.u32 %v20_v6, 7 }
   0x5   :  { %v22_v10 = vsub.s32 0, %v21_v7  ;;  %v76_v19 = vsub.s32 1, %v21_v7 }
   0x6   :  { %142 = vmatmul.mubr.msk.bf16.vlgmr.msra.gmra.mxu0 %vm24_vm2, %v19_v4 }
   0x7   :  { %v23_v11 = vrot.slane %v17_v9, %v22_v10  ;;  %v77_v20 = vrot.slane %v17_v9, %v76_v19 }
  0xc6   :  { %v66_v12 = vpop.f32.mrf.mxu0 }
  0xc7   :  { %v67_v13 = vadd.f32 %v66_v12, %v23_v11 }
  0xc8   :  { %v143_v14 = vpop.f32.mrf.mxu0 }
  0xc9   :  { %154 = vtanh.f32 %v67_v13 }
  0xca   :  { %v69_v15 = vpop.f32.mrf.mxu0 }
  0xcc   :  { %v144_v16 = vpop.f32.mrf.mxu0 }
  0xd6   :  { %v155_v17 = vpop.eup %154 }
  0xd7   :  { %v73_v18 = vpack.c.bf16 %v155_v17, %v155_v17 }
  0xd9   :  { %148 = vmatmul.mubr.bf16.vlgmr.msra.gmra.mxu1 %v73_v18 }
 0x199   :  { %v112_v21 = vpop.f32.mrf.mxu1 }
 0x19a   :  { %v113_v22 = vadd.f32 %v112_v21, %v77_v20 }
 0x19b   :  { %v149_v23 = vpop.f32.mrf.mxu1 }
 0x19c   :  { %119 = vst.msk [vmem:[%s199_s2] sm:$0xff] %vm118_vm3, %v113_v22  ;;  %121 = vrot.lane.b32.xlu0 %v113_v22, %s158_s20 }
 0x19d   :  { %v115_v24 = vpop.f32.mrf.mxu1 }
 0x19f   :  { %v150_v25 = vpop.f32.mrf.mxu1 }
 0x20e   :  { %v122_v26 = vpop.permute.xlu0 %121 }
 0x20f   :  { %125 = vst.msk [vmem:[%s200_s3] sm:$0xff] %vm124_vm4, %v122_v26 }

</bundles_post_ra>
